<compile_context>
chip_gen: v7x
topology: tpu7x:2x2x1
jax: 0.10.0
libtpu: 0.0.40
codegen_flags: <defaults>
</compile_context>

<pallas_src>
import functools

import jax
import jax.numpy as jnp
from jax.experimental import pallas as pl
from jax.experimental.pallas import tpu as pltpu


# default class weights of the PyTorch module (=> 6 classes)
_DEFAULT_WEIGHT = (1.0405, 0.9311, 1.0038, 1.1441, 1.0039, 0.8766)


def _round_up(x, m):
    return (x + m - 1) // m * m


def _ce_dice_kernel(logits_ref, target_ref, weight_ref,
                    ce_num_ref, ce_den_ref, inter_ref, psum_ref,
                    *, ignore_index, tl, hw):
    x = logits_ref[...].astype(jnp.float32)        # (1, C, TL)  classes on sublanes
    t = target_ref[...]                            # (1, 1, TL)  int32
    w = weight_ref[...].astype(jnp.float32)        # (1, C, 1)

    # numerically stable log-sum-exp / softmax over the class (sublane) axis
    m = jnp.max(x, axis=1, keepdims=True)          # (1, 1, TL)
    e = jnp.exp(x - m)                             # (1, C, TL)
    sumexp = jnp.sum(e, axis=1, keepdims=True)     # (1, 1, TL)
    lse = m + jnp.log(sumexp)                      # (1, 1, TL)

    # one-hot of the target class (no dynamic gather)
    cls = jax.lax.broadcasted_iota(jnp.int32, x.shape, 1)
    onehot = cls == t                              # (1, C, TL)
    x_t = jnp.sum(jnp.where(onehot, x, 0.0), axis=1, keepdims=True)
    w_t = jnp.sum(jnp.where(onehot, w, 0.0), axis=1, keepdims=True)

    # masks: pixels beyond H*W (padding) and ignore_index pixels
    lane = jax.lax.broadcasted_iota(jnp.int32, t.shape, 2)
    inb = (pl.program_id(1) * tl + lane) < hw      # in-bounds pixels
    valid = (t != ignore_index) & inb              # pixels that count for CE / one-hot

    ce = lse - x_t                                 # per-pixel unweighted CE
    p_t = jnp.exp(x_t - lse)                       # softmax prob of the target class
    sm_pix = jnp.sum(e / sumexp, axis=1, keepdims=True)  # sum of softmax per pixel (~1)

    # per-tile partial sums (tiny parallel outputs; summed in the wrapper)
    ce_num_ref[...] = jnp.sum(jnp.where(valid, w_t * ce, 0.0)).reshape(1, 1, 1, 1)
    ce_den_ref[...] = jnp.sum(jnp.where(valid, w_t, 0.0)).reshape(1, 1, 1, 1)
    inter_ref[...] = jnp.sum(jnp.where(valid, p_t, 0.0)).reshape(1, 1, 1, 1)
    psum_ref[...] = jnp.sum(jnp.where(inb, sm_pix, 0.0)).reshape(1, 1, 1, 1)


def cross_entropy_dice_loss(score_nchw, target_nhw, *, weight=None,
                            ignore_index=-1, smooth=1.0, tl=None):
    """Forward of CrossEntropy (weighted CE + DiceLoss) from the torch spec."""
    N, C, H, W = score_nchw.shape
    th, tw = target_nhw.shape[1], target_nhw.shape[2]
    if (H, W) != (th, tw):
        # torch: F.upsample(..., mode='bilinear') (align_corners=False semantics)
        score_nchw = jax.image.resize(score_nchw, (N, C, th, tw), method="bilinear")
        H, W = th, tw

    if weight is None:
        weight = jnp.asarray(_DEFAULT_WEIGHT, dtype=jnp.float32)
    weight = jnp.asarray(weight, jnp.float32).reshape(1, C, 1)

    HW = H * W
    if tl is None:
        # ~1.5 MiB f32 logits block for C=6: fits v5e/v6e/v7x scoped VMEM with
        # double buffering while amortizing per-grid-step overhead.
        tl = 64 * 1024
    tl = min(_round_up(int(tl), 128), _round_up(HW, 128))
    HWp = _round_up(HW, tl)
    Lt = HWp // tl

    x = score_nchw.reshape(N, C, HW)               # free contiguous view (no transpose)
    t = target_nhw.reshape(N, 1, HW).astype(jnp.int32)
    if HWp != HW:
        x = jnp.pad(x, ((0, 0), (0, 0), (0, HWp - HW)))
        t = jnp.pad(t, ((0, 0), (0, 0), (0, HWp - HW)),
                    constant_values=ignore_index)

    kernel = functools.partial(_ce_dice_kernel,
                               ignore_index=int(ignore_index),
                               tl=int(tl), hw=int(HW))

    part_shape = jax.ShapeDtypeStruct((N, Lt, 1, 1), jnp.float32)
    part_spec = pl.BlockSpec((1, 1, 1, 1), lambda n, l: (n, l, 0, 0))

    ce_num, ce_den, inter, psum = pl.pallas_call(
        kernel,
        out_shape=(part_shape,) * 4,
        grid_spec=pltpu.PrefetchScalarGridSpec(
            num_scalar_prefetch=0,
            grid=(N, Lt),
            in_specs=[
                pl.BlockSpec((1, C, tl), lambda n, l: (n, 0, l)),   # logits
                pl.BlockSpec((1, 1, tl), lambda n, l: (n, 0, l)),   # target
                pl.BlockSpec((1, C, 1), lambda n, l: (0, 0, 0)),    # class weights
            ],
            out_specs=(part_spec,) * 4,
        ),
        compiler_params=pltpu.CompilerParams(
            dimension_semantics=("parallel", "parallel"),
            vmem_limit_bytes=32 * 1024 * 1024),
    )(x, t, weight)

    ce_num_t = jnp.sum(ce_num)
    ce_den_t = jnp.sum(ce_den)
    inter_t = jnp.sum(inter)
    psum_t = jnp.sum(psum)
    # number of pixels that receive a one-hot 1 (= valid, non-ignored pixels)
    tsum_t = jnp.sum((target_nhw != ignore_index).astype(jnp.float32))

    ce_loss = ce_num_t / ce_den_t                  # weighted-mean CE (torch reduction)
    # TODO(synk): the torch DiceLoss scatters one-hot with index -1 for
    # ignore_index pixels (undefined / error in torch); here those pixels get
    # an all-zero one-hot row (they still contribute to the softmax sum).
    dice = 1.0 - (2.0 * inter_t + smooth) / (psum_t + tsum_t + smooth)
    return ce_loss + dice


def _cross_entropy_dice_ref(score, target, weight, ignore_index=-1, smooth=1.0):
    """Pure-JAX reference mirroring the torch semantics (same ignore handling)."""
    N, C, H, W = score.shape
    x = jnp.transpose(score, (0, 2, 3, 1)).reshape(-1, C).astype(jnp.float32)
    t = target.reshape(-1).astype(jnp.int32)
    m = jnp.max(x, axis=-1, keepdims=True)
    e = jnp.exp(x - m)
    sumexp = jnp.sum(e, axis=-1, keepdims=True)
    lse = (m + jnp.log(sumexp))[:, 0]
    valid = t != ignore_index
    tc = jnp.clip(t, 0, C - 1)
    x_t = jnp.take_along_axis(x, tc[:, None], axis=-1)[:, 0]
    w_t = jnp.asarray(weight, jnp.float32)[tc]
    ce = (jnp.sum(jnp.where(valid, w_t * (lse - x_t), 0.0)) /
          jnp.sum(jnp.where(valid, w_t, 0.0)))
    sm = e / sumexp
    p_t = jnp.take_along_axis(sm, tc[:, None], axis=-1)[:, 0]
    inter = jnp.sum(jnp.where(valid, p_t, 0.0))
    dice = 1.0 - (2.0 * inter + smooth) / (
        jnp.sum(sm) + jnp.sum(valid.astype(jnp.float32)) + smooth)
    return ce + dice


if __name__ == "__main__":
    key = jax.random.PRNGKey(0)
    k1, k2, k3 = jax.random.split(key, 3)

    N, C, H, W = 2, 6, 16, 16          # C=6 matches the default class weights
    score = jax.random.normal(k1, (N, C, H, W), dtype=jnp.float32)
    target = jax.random.randint(k2, (N, H, W), 0, C, dtype=jnp.int32)
    # sprinkle in some ignore_index (-1) pixels to exercise the CE masking
    ignore_mask = jax.random.bernoulli(k3, 0.1, (N, H, W))
    target = jnp.where(ignore_mask, jnp.int32(-1), target)

    weight = jnp.asarray(_DEFAULT_WEIGHT, jnp.float32)

    out = cross_entropy_dice_loss(score, target, weight=weight,
                                  ignore_index=-1, smooth=1.0)
    out = jax.block_until_ready(out)

    ref = _cross_entropy_dice_ref(score, target, weight,
                                  ignore_index=-1, smooth=1.0)
    assert jnp.allclose(out, ref, rtol=1e-4, atol=1e-4), (out, ref)

    print("KERNEL_OK")
</pallas_src>

<mosaic_0001>
module attributes {stable_mosaic.version = 11 : i64} {
  func.func @_ce_dice_kernel(%arg0: i32, %arg1: i32, %arg2: memref<1x6x256xf32, #tpu.memory_space<vmem>>, %arg3: memref<1x1x256xi32, #tpu.memory_space<vmem>>, %arg4: memref<1x6x1xf32, #tpu.memory_space<vmem>>, %arg5: memref<1x1x1x1xf32, #tpu.memory_space<vmem>>, %arg6: memref<1x1x1x1xf32, #tpu.memory_space<vmem>>, %arg7: memref<1x1x1x1xf32, #tpu.memory_space<vmem>>, %arg8: memref<1x1x1x1xf32, #tpu.memory_space<vmem>>) attributes {dimension_semantics = [#tpu.dimension_semantics<parallel>, #tpu.dimension_semantics<parallel>], iteration_bounds = array<i64: 2, 1>, scalar_prefetch = 0 : i64, scratch_operands = 0 : i64, tpu.core_type = #tpu.core_type<tc>, window_params = [{transform_indices = @transform_0, window_bounds = array<i64: 1, 6, 256>}, {transform_indices = @transform_1, window_bounds = array<i64: 1, 1, 256>}, {pipeline_mode = #tpu.pipeline_mode<synchronous>, transform_indices = @transform_2, window_bounds = array<i64: 1, 6, 1>}, {transform_indices = @transform_3, window_bounds = array<i64: 1, 1, 1, 1>}, {transform_indices = @transform_4, window_bounds = array<i64: 1, 1, 1, 1>}, {transform_indices = @transform_5, window_bounds = array<i64: 1, 1, 1, 1>}, {transform_indices = @transform_6, window_bounds = array<i64: 1, 1, 1, 1>}]} {
    %c0 = arith.constant 0 : index
    %c0_0 = arith.constant 0 : index
    %c0_1 = arith.constant 0 : index
    %0 = vector.load %arg2[%c0, %c0_0, %c0_1] : memref<1x6x256xf32, #tpu.memory_space<vmem>>, vector<1x6x256xf32>
    %c0_2 = arith.constant 0 : index
    %c0_3 = arith.constant 0 : index
    %c0_4 = arith.constant 0 : index
    %1 = vector.load %arg3[%c0_2, %c0_3, %c0_4] : memref<1x1x256xi32, #tpu.memory_space<vmem>>, vector<1x1x256xi32>
    %c0_5 = arith.constant 0 : index
    %c0_6 = arith.constant 0 : index
    %c0_7 = arith.constant 0 : index
    %2 = vector.load %arg4[%c0_5, %c0_6, %c0_7] : memref<1x6x1xf32, #tpu.memory_space<vmem>>, vector<1x6x1xf32>
    %cst = arith.constant dense<0xFF800000> : vector<1x256xf32>
    %3 = vector.multi_reduction <maximumf>, %0, %cst [1] : vector<1x6x256xf32> to vector<1x256xf32>
    %4 = vector.shape_cast %3 : vector<1x256xf32> to vector<1x1x256xf32>
    %5 = vector.broadcast %4 : vector<1x1x256xf32> to vector<1x6x256xf32>
    %6 = arith.subf %0, %5 : vector<1x6x256xf32>
    %7 = math.exp %6 : vector<1x6x256xf32>
    %cst_8 = arith.constant dense<0.000000e+00> : vector<1x256xf32>
    %8 = vector.multi_reduction <add>, %7, %cst_8 [1] : vector<1x6x256xf32> to vector<1x256xf32>
    %9 = vector.shape_cast %8 : vector<1x256xf32> to vector<1x1x256xf32>
    %10 = math.log %9 : vector<1x1x256xf32>
    %11 = arith.addf %4, %10 : vector<1x1x256xf32>
    %12 = tpu.iota {dimensions = array<i32: 1>} : vector<1x6x256xi32>
    %13 = vector.broadcast %1 : vector<1x1x256xi32> to vector<1x6x256xi32>
    %14 = arith.cmpi eq, %12, %13 : vector<1x6x256xi32>
    %cst_9 = arith.constant 0.000000e+00 : f32
    %15 = vector.broadcast %cst_9 : f32 to vector<1x6x256xf32>
    %16 = arith.select %14, %0, %15 : vector<1x6x256xi1>, vector<1x6x256xf32>
    %cst_10 = arith.constant dense<0.000000e+00> : vector<1x256xf32>
    %17 = vector.multi_reduction <add>, %16, %cst_10 [1] : vector<1x6x256xf32> to vector<1x256xf32>
    %18 = vector.shape_cast %17 : vector<1x256xf32> to vector<1x1x256xf32>
    %cst_11 = arith.constant 0.000000e+00 : f32
    %19 = vector.shape_cast %2 : vector<1x6x1xf32> to vector<1x6x1xf32>
    %20 = vector.broadcast %19 : vector<1x6x1xf32> to vector<1x6x256xf32>
    %21 = vector.broadcast %cst_11 : f32 to vector<1x6x256xf32>
    %22 = arith.select %14, %20, %21 : vector<1x6x256xi1>, vector<1x6x256xf32>
    %cst_12 = arith.constant dense<0.000000e+00> : vector<1x256xf32>
    %23 = vector.multi_reduction <add>, %22, %cst_12 [1] : vector<1x6x256xf32> to vector<1x256xf32>
    %24 = vector.shape_cast %23 : vector<1x256xf32> to vector<1x1x256xf32>
    %25 = tpu.iota {dimensions = array<i32: 2>} : vector<1x1x256xi32>
    %c256_i32 = arith.constant 256 : i32
    %26 = arith.muli %arg1, %c256_i32 : i32
    %27 = vector.broadcast %26 : i32 to vector<1x1x256xi32>
    %28 = arith.addi %27, %25 : vector<1x1x256xi32>
    %c256_i32_13 = arith.constant 256 : i32
    %29 = vector.broadcast %c256_i32_13 : i32 to vector<1x1x256xi32>
    %30 = arith.cmpi slt, %28, %29 : vector<1x1x256xi32>
    %c-1_i32 = arith.constant -1 : i32
    %31 = vector.broadcast %c-1_i32 : i32 to vector<1x1x256xi32>
    %32 = arith.cmpi ne, %1, %31 : vector<1x1x256xi32>
    %33 = arith.andi %32, %30 : vector<1x1x256xi1>
    %34 = arith.subf %11, %18 : vector<1x1x256xf32>
    %35 = arith.subf %18, %11 : vector<1x1x256xf32>
    %36 = math.exp %35 : vector<1x1x256xf32>
    %37 = vector.broadcast %9 : vector<1x1x256xf32> to vector<1x6x256xf32>
    %38 = arith.divf %7, %37 : vector<1x6x256xf32>
    %cst_14 = arith.constant dense<0.000000e+00> : vector<1x256xf32>
    %39 = vector.multi_reduction <add>, %38, %cst_14 [1] : vector<1x6x256xf32> to vector<1x256xf32>
    %40 = vector.shape_cast %39 : vector<1x256xf32> to vector<1x1x256xf32>
    %41 = arith.mulf %24, %34 : vector<1x1x256xf32>
    %cst_15 = arith.constant 0.000000e+00 : f32
    %42 = vector.broadcast %cst_15 : f32 to vector<1x1x256xf32>
    %43 = arith.select %33, %41, %42 : vector<1x1x256xi1>, vector<1x1x256xf32>
    %44 = vector.shape_cast %43 : vector<1x1x256xf32> to vector<1x1x1x256xf32>
    %cst_16 = arith.constant dense<0.000000e+00> : vector<1xf32>
    %45 = vector.multi_reduction <add>, %44, %cst_16 [1, 2, 3] : vector<1x1x1x256xf32> to vector<1xf32>
    %46 = vector.shape_cast %45 : vector<1xf32> to vector<1x1x1x1xf32>
    %47 = vector.extract %46[0, 0, 0, 0] : f32 from vector<1x1x1x1xf32>
    %48 = vector.broadcast %47 : f32 to vector<1x1x1x1xf32>
    %c0_17 = arith.constant 0 : index
    %c0_18 = arith.constant 0 : index
    %c0_19 = arith.constant 0 : index
    %c0_20 = arith.constant 0 : index
    %49 = vector.load %arg5[%c0_17, %c0_18, %c0_19, %c0_20] : memref<1x1x1x1xf32, #tpu.memory_space<vmem>>, vector<1x1x1x1xf32>
    tpu.vector_store %arg5[%c0_17, %c0_18, %c0_19, %c0_20], %48 {strides = array<i32>} : memref<1x1x1x1xf32, #tpu.memory_space<vmem>>, vector<1x1x1x1xf32>,
    %cst_21 = arith.constant 0.000000e+00 : f32
    %50 = vector.broadcast %cst_21 : f32 to vector<1x1x256xf32>
    %51 = arith.select %33, %24, %50 : vector<1x1x256xi1>, vector<1x1x256xf32>
    %52 = vector.shape_cast %51 : vector<1x1x256xf32> to vector<1x1x1x256xf32>
    %cst_22 = arith.constant dense<0.000000e+00> : vector<1xf32>
    %53 = vector.multi_reduction <add>, %52, %cst_22 [1, 2, 3] : vector<1x1x1x256xf32> to vector<1xf32>
    %54 = vector.shape_cast %53 : vector<1xf32> to vector<1x1x1x1xf32>
    %55 = vector.extract %54[0, 0, 0, 0] : f32 from vector<1x1x1x1xf32>
    %56 = vector.broadcast %55 : f32 to vector<1x1x1x1xf32>
    %c0_23 = arith.constant 0 : index
    %c0_24 = arith.constant 0 : index
    %c0_25 = arith.constant 0 : index
    %c0_26 = arith.constant 0 : index
    %57 = vector.load %arg6[%c0_23, %c0_24, %c0_25, %c0_26] : memref<1x1x1x1xf32, #tpu.memory_space<vmem>>, vector<1x1x1x1xf32>
    tpu.vector_store %arg6[%c0_23, %c0_24, %c0_25, %c0_26], %56 {strides = array<i32>} : memref<1x1x1x1xf32, #tpu.memory_space<vmem>>, vector<1x1x1x1xf32>,
    %cst_27 = arith.constant 0.000000e+00 : f32
    %58 = vector.broadcast %cst_27 : f32 to vector<1x1x256xf32>
    %59 = arith.select %33, %36, %58 : vector<1x1x256xi1>, vector<1x1x256xf32>
    %60 = vector.shape_cast %59 : vector<1x1x256xf32> to vector<1x1x1x256xf32>
    %cst_28 = arith.constant dense<0.000000e+00> : vector<1xf32>
    %61 = vector.multi_reduction <add>, %60, %cst_28 [1, 2, 3] : vector<1x1x1x256xf32> to vector<1xf32>
    %62 = vector.shape_cast %61 : vector<1xf32> to vector<1x1x1x1xf32>
    %63 = vector.extract %62[0, 0, 0, 0] : f32 from vector<1x1x1x1xf32>
    %64 = vector.broadcast %63 : f32 to vector<1x1x1x1xf32>
    %c0_29 = arith.constant 0 : index
    %c0_30 = arith.constant 0 : index
    %c0_31 = arith.constant 0 : index
    %c0_32 = arith.constant 0 : index
    %65 = vector.load %arg7[%c0_29, %c0_30, %c0_31, %c0_32] : memref<1x1x1x1xf32, #tpu.memory_space<vmem>>, vector<1x1x1x1xf32>
    tpu.vector_store %arg7[%c0_29, %c0_30, %c0_31, %c0_32], %64 {strides = array<i32>} : memref<1x1x1x1xf32, #tpu.memory_space<vmem>>, vector<1x1x1x1xf32>,
    %cst_33 = arith.constant 0.000000e+00 : f32
    %66 = vector.broadcast %cst_33 : f32 to vector<1x1x256xf32>
    %67 = arith.select %30, %40, %66 : vector<1x1x256xi1>, vector<1x1x256xf32>
    %68 = vector.shape_cast %67 : vector<1x1x256xf32> to vector<1x1x1x256xf32>
    %cst_34 = arith.constant dense<0.000000e+00> : vector<1xf32>
    %69 = vector.multi_reduction <add>, %68, %cst_34 [1, 2, 3] : vector<1x1x1x256xf32> to vector<1xf32>
    %70 = vector.shape_cast %69 : vector<1xf32> to vector<1x1x1x1xf32>
    %71 = vector.extract %70[0, 0, 0, 0] : f32 from vector<1x1x1x1xf32>
    %72 = vector.broadcast %71 : f32 to vector<1x1x1x1xf32>
    %c0_35 = arith.constant 0 : index
    %c0_36 = arith.constant 0 : index
    %c0_37 = arith.constant 0 : index
    %c0_38 = arith.constant 0 : index
    %73 = vector.load %arg8[%c0_35, %c0_36, %c0_37, %c0_38] : memref<1x1x1x1xf32, #tpu.memory_space<vmem>>, vector<1x1x1x1xf32>
    tpu.vector_store %arg8[%c0_35, %c0_36, %c0_37, %c0_38], %72 {strides = array<i32>} : memref<1x1x1x1xf32, #tpu.memory_space<vmem>>, vector<1x1x1x1xf32>,
    return
  }
  func.func @transform_0(%arg0: i32, %arg1: i32) -> (i32, i32, i32) {
    %c0_i32 = arith.constant 0 : i32
    %c0_i32_0 = arith.constant 0 : i32
    return %arg0, %c0_i32, %arg1 : i32, i32, i32
  }
  func.func @transform_1(%arg0: i32, %arg1: i32) -> (i32, i32, i32) {
    %c0_i32 = arith.constant 0 : i32
    %c0_i32_0 = arith.constant 0 : i32
    return %arg0, %c0_i32, %arg1 : i32, i32, i32
  }
  func.func @transform_2(%arg0: i32, %arg1: i32) -> (i32, i32, i32) {
    %c0_i32 = arith.constant 0 : i32
    %c0_i32_0 = arith.constant 0 : i32
    %c0_i32_1 = arith.constant 0 : i32
    %c0_i32_2 = arith.constant 0 : i32
    return %c0_i32, %c0_i32_0, %c0_i32_1 : i32, i32, i32
  }
  func.func @transform_3(%arg0: i32, %arg1: i32) -> (i32, i32, i32, i32) {
    %c0_i32 = arith.constant 0 : i32
    %c0_i32_0 = arith.constant 0 : i32
    %c0_i32_1 = arith.constant 0 : i32
    return %arg0, %arg1, %c0_i32, %c0_i32_0 : i32, i32, i32, i32
  }
  func.func @transform_4(%arg0: i32, %arg1: i32) -> (i32, i32, i32, i32) {
    %c0_i32 = arith.constant 0 : i32
    %c0_i32_0 = arith.constant 0 : i32
    %c0_i32_1 = arith.constant 0 : i32
    return %arg0, %arg1, %c0_i32, %c0_i32_0 : i32, i32, i32, i32
  }
  func.func @transform_5(%arg0: i32, %arg1: i32) -> (i32, i32, i32, i32) {
    %c0_i32 = arith.constant 0 : i32
    %c0_i32_0 = arith.constant 0 : i32
    %c0_i32_1 = arith.constant 0 : i32
    return %arg0, %arg1, %c0_i32, %c0_i32_0 : i32, i32, i32, i32
  }
  func.func @transform_6(%arg0: i32, %arg1: i32) -> (i32, i32, i32, i32) {
    %c0_i32 = arith.constant 0 : i32
    %c0_i32_0 = arith.constant 0 : i32
    %c0_i32_1 = arith.constant 0 : i32
    return %arg0, %arg1, %c0_i32, %c0_i32_0 : i32, i32, i32, i32
  }
}

</mosaic_0001>

<bundles_post_ra>
// kernel: tpu_custom_call.1
= control target key start
LH: loop header
LB: loop body
LE: loop exit
PB: predicated region body
PF: predicated region fallthrough
CT: control target
= control target key end

     0   :  { %s983_s21 = smov 0   ;;  %s985_s22 = smov 0   ;;  %s1115_s0 = inlined_call_operand.vmem [shape: f32[2,6,256], index: 0, kind: input, shape index: {}]   ;;  %s1116_s1 = inlined_call_operand.vmem [shape: s32[2,1,256], index: 1, kind: input, shape index: {}]   ;;  %s1117_s2 = inlined_call_operand.vmem [shape: f32[1,6,1], index: 2, kind: input, shape index: {}]   ;;  %s1118_s3 = inlined_call_operand.vmem [shape: f32[2,1,1,1], index: 3, kind: output, shape index: {0}]   ;;  %s1119_s4 = inlined_call_operand.vmem [shape: f32[2,1,1,1], index: 4, kind: output, shape index: {1}]   ;;  %s1120_s5 = inlined_call_operand.vmem [shape: f32[2,1,1,1], index: 5, kind: output, shape index: {2}]   ;;  %s1121_s6 = inlined_call_operand.vmem [shape: f32[2,1,1,1], index: 6, kind: output, shape index: {3}]  }
   0x1   :  { %s987_s23 = smov 0  }
   0x2 LB: > { %s29_s24 = sadd.s32 1, %s939_s22  ;;  %p862_p0 = scmp.ge.s32.totalorder %s943_s23, 1  ;;  %s943_s23 = sphi %s987_s23, %s17_s23   ;;  %s939_s22 = sphi %s985_s22, %s1129_s22   ;;  %s935_s21 = sphi %s983_s21, %s1128_s21  }
   0x3   : > { %p31_p1 = scmp.ge.s32.totalorder %s29_s24, 2  ;;  %p262_p2 = scmp.lt.s32.totalorder %s943_s23, 3 }
   0x5   : > { %s1131_s24 = smov (%p31_p1, %s29_s24), 0  ;;  %p263_p3 = pnand %p862_p0, %p262_p2 }
   0x6   : > { %v369_v0 = vld [vmem:[%s1117_s2] sm:$0x3f] (!%p263_p3)  ;;  %v945_v1 = vmov (!%p263_p3), 0   ;;  %p324_p4 = scmp.lt.s32.totalorder (!%p263_p3), %s935_s21, 1  ;;  %vm370_vm0 = vcmask (!%p263_p3), 1045504   ;;  %v411_v24 = vlaneseq (!%p263_p3)  ;;  %vm547_vm6 = vcmask (!%p263_p3), 1040384  }
   0x7   : > { %266 = sbr.rel (%p263_p3) target bundleno = 376 (0x178), region = 32  ;;  %904 = vset.pattern.permute.xlu0 (!%p263_p3), %v945_v1  ;;  %vm561_vm7 = vcmask (!%p263_p3), 0  }
   0x8   : > { %441 = vperm.xlu0 (!%p263_p3), %904, %v369_v0   ;;  %v1021_v27 = vshrl.u32 (!%p263_p3), %v411_v24, 7 }
   0xa   : > { %v1027_v30 = vsub.s32 (!%p263_p3), 0, %v1021_v27  ;;  %v1030_v32 = vsub.s32 (!%p263_p3), 1, %v1021_v27 }
   0xe   : > { %s1133_s21 = smov (!%p324_p4, %s935_s21), 1 }
   0xf   : > { %s868_s27 = sshll.u32 %s1133_s21, 4  ;;  %s865_s7 = sshll.u32 %s1133_s21, 1 }
  0x10   : > { %s331_s30 = scalar_lea.vmem %s1115_s0, %s868_s27  ;;  %s340_s10 = scalar_lea.vmem %s1116_s1, %s865_s7 }
  0x11   : > { %v366_v2 = vld [vmem:[%s331_s30] sm:$0x3f]  ;;  %v367_v3 = vld [vmem:[%s331_s30 + $0x8] sm:$0x3f]  ;;  %s347_s13 = scalar_lea.vmem %s1118_s3, %s1133_s21  ;;  %s353_s17 = scalar_lea.vmem %s1119_s4, %s1133_s21 }
  0x12   : > { %v371_v4 = vsel %vm370_vm0, %v366_v2, -inf  ;;  %v378_v5 = vsel %vm370_vm0, %v367_v3, -inf  ;;  %v1032_v33 = vld [vmem:[%s340_s10] sm:$0x3]  ;;  %s359_s25 = scalar_lea.vmem %s1120_s5, %s1133_s21  ;;  %s365_s29 = scalar_lea.vmem %s1121_s6, %s1133_s21 }
  0x13   : > { %v372_v6 = vrot.slane %v371_v4, 4  ;;  %v379_v7 = vrot.slane %v378_v5, 4  ;;  %v416_v36 = vrot.slane %v1032_v33, %v1027_v30  ;;  %v420_v38 = vrot.slane %v1032_v33, %v1030_v32 }
  0x14   : > { %vm469_vm3 = vcmp.ne.s32.totalorder %v1032_v33, 4294967295 }
  0x15   : > { %v373_v8 = vmax.f32 %v371_v4, %v372_v6  ;;  %v380_v9 = vmax.f32 %v378_v5, %v379_v7  ;;  %vm1039_vm1 = vcmp.eq.s32.totalorder %v1021_v27, %v416_v36  ;;  %vm1044_vm2 = vcmp.eq.s32.totalorder %v1021_v27, %v420_v38 }
  0x16   : > { %v423_v43 = vsel %vm1039_vm1, %v366_v2, 0.0  ;;  %v424_v45 = vsel %vm1044_vm2, %v367_v3, 0.0 }
  0x17   : > { %v374_v10 = vrot.slane %v373_v8, 2  ;;  %v381_v11 = vrot.slane %v380_v9, 2  ;;  %v425_v47 = vsel %vm370_vm0, %v423_v43, 0.0  ;;  %v432_v48 = vsel %vm370_vm0, %v424_v45, 0.0 }
  0x18   : > { %v426_v51 = vrot.slane %v425_v47, 4  ;;  %v433_v52 = vrot.slane %v432_v48, 4 }
  0x19   : > { %v375_v12 = vmax.f32 %v373_v8, %v374_v10  ;;  %v382_v13 = vmax.f32 %v380_v9, %v381_v11  ;;  %v946_v11 = vmov 1966171168  }
  0x1a   : > { %v427_v53 = vadd.f32 %v426_v51, %v425_v47  ;;  %v434_v54 = vadd.f32 %v433_v52, %v432_v48 }
  0x1b   : > { %v376_v14 = vrot.slane %v375_v12, 1  ;;  %v383_v15 = vrot.slane %v382_v13, 1 }
  0x1c   : > { %v428_v55 = vrot.slane %v427_v53, 2  ;;  %v435_v56 = vrot.slane %v434_v54, 2 }
  0x1d   : > { %v377_v16 = vmax.f32 %v375_v12, %v376_v14  ;;  %v384_v17 = vmax.f32 %v382_v13, %v383_v15  ;;  %v474_v12 = vunpack.c.l.s4 %v946_v11 }
  0x1e   : > { %v429_v57 = vadd.f32 %v428_v55, %v427_v53  ;;  %v436_v59 = vadd.f32 %v435_v56, %v434_v54 }
  0x1f   : > { %v385_v18 = vsub.f32 %v366_v2, %v377_v16  ;;  %v386_v19 = vsub.f32 %v367_v3, %v384_v17  ;;  %v475_v15 = vunpack.c.0.s8 %v474_v12 }
  0x20   : > { %v430_v62 = vrot.slane %v429_v57, 1  ;;  %v437_v0 = vrot.slane %v436_v59, 1 }
  0x21   : > { %v387_v20 = vmul.f32 1.442695, %v385_v18  ;;  %v389_v21 = vmul.f32 1.442695, %v386_v19  ;;  %v478_v19 = vsub.s32 %v475_v15, %v1021_v27 }
  0x22   : > { %v431_v2 = vadd.f32 %v430_v62, %v429_v57  ;;  %v438_v4 = vadd.f32 %v437_v0, %v436_v59 }
  0x23   : > { %905 = vpow2.f32 %v387_v20 }
  0x24   : > { %907 = vpow2.f32 %v389_v21  ;;  %v947_v21 = vmov 1  }
  0x25   : > { %v472_v24 = vcombine.low %v947_v21, %v947_v21 }
  0x27   : > { %v479_v36 = vrot.slane %v472_v24, %v478_v19 }
  0x2d   : > { %v1012_v22 = vpop.eup %905 }
  0x2e   : > { %v1014_v23 = vpop.eup %907  ;;  %v391_v25 = vsel %vm370_vm0, %v1012_v22, 0.0 }
  0x2f   : > { %v398_v26 = vsel %vm370_vm0, %v1014_v23, 0.0  ;;  %v392_v28 = vrot.slane %v391_v25, 4 }
  0x30   : > { %v399_v29 = vrot.slane %v398_v26, 4 }
  0x31   : > { %v393_v31 = vadd.f32 %v392_v28, %v391_v25 }
  0x32   : > { %v400_v34 = vadd.f32 %v399_v29, %v398_v26 }
  0x33   : > { %v394_v35 = vrot.slane %v393_v31, 2 }
  0x34   : > { %v401_v37 = vrot.slane %v400_v34, 2 }
  0x35   : > { %v395_v39 = vadd.f32 %v394_v35, %v393_v31 }
  0x36   : > { %v402_v41 = vadd.f32 %v401_v37, %v400_v34 }
  0x37   : > { %v396_v44 = vrot.slane %v395_v39, 1 }
  0x38   : > { %v403_v46 = vrot.slane %v402_v41, 1 }
  0x39   : > { %v397_v49 = vadd.f32 %v396_v44, %v395_v39  ;;  %v486_v44 = vrot.slane %v479_v36, %v478_v19 }
  0x3a   : > { %v404_v50 = vadd.f32 %v403_v46, %v402_v41 }
  0x3b   : > { %909 = vlog2.f32 %v397_v49  ;;  %vm487_vm4 = vcmp.ne.s32.totalorder %v486_v44, 0 }
  0x3c   : > { %911 = vlog2.f32 %v404_v50  ;;  %vm1066_vm5 = vmand %vm469_vm3, %vm487_vm4 }
  0x3d   : > { %913 = vrcp.f32 %v397_v49 }
  0x3e   : > { %915 = vrcp.f32 %v404_v50 }
  0x45   : > { %v910_v58 = vpop.eup %909 }
  0x46   : > { %v912_v60 = vpop.eup %911  ;;  %v406_v61 = vmul.f32 0.6931472, %v910_v58 }
  0x47   : > { %v408_v63 = vmul.f32 0.6931472, %v912_v60  ;;  %v914_v9 = vpop.eup %913 }
  0x48   : > { %v409_v1 = vadd.f32 %v406_v61, %v377_v16  ;;  %v916_v10 = vpop.eup %915  ;;  %v498_v13 = vmul.f32 %v914_v9, %v1012_v22 }
  0x49   : > { %v410_v3 = vadd.f32 %v408_v63, %v384_v17  ;;  %v500_v14 = vmul.f32 %v916_v10, %v1014_v23 }
  0x4a   : > { %v491_v5 = vsub.f32 %v431_v2, %v409_v1  ;;  %v501_v16 = vsel %vm370_vm0, %v498_v13, 0.0  ;;  %v489_v51 = vsub.f32 %v409_v1, %v431_v2 }
  0x4b   : > { %v492_v6 = vsub.f32 %v438_v4, %v410_v3  ;;  %v508_v17 = vsel %vm370_vm0, %v500_v14, 0.0  ;;  %v502_v29 = vrot.slane %v501_v16, 4  ;;  %v490_v52 = vsub.f32 %v410_v3, %v438_v4 }
  0x4c   : > { %v493_v7 = vmul.f32 1.442695, %v491_v5  ;;  %v509_v31 = vrot.slane %v508_v17, 4 }
  0x4d   : > { %v495_v8 = vmul.f32 1.442695, %v492_v6  ;;  %v503_v39 = vadd.f32 %v502_v29, %v501_v16 }
  0x4e   : > { %917 = vpow2.f32 %v493_v7  ;;  %v510_v41 = vadd.f32 %v509_v31, %v508_v17 }
  0x4f   : > { %919 = vpow2.f32 %v495_v8  ;;  %v504_v47 = vrot.slane %v503_v39, 2 }
  0x50   : > { %v511_v48 = vrot.slane %v510_v41, 2 }
  0x51   : > { %v505_v56 = vadd.f32 %v504_v47, %v503_v39 }
  0x52   : > { %v512_v57 = vadd.f32 %v511_v48, %v510_v41 }
  0x53   : > { %v506_v1 = vrot.slane %v505_v56, 1 }
  0x54   : > { %v513_v33 = vrot.slane %v512_v57, 1 }
  0x55   : > { %v507_v10 = vadd.f32 %v506_v1, %v505_v56 }
  0x56   : > { %v514_v14 = vadd.f32 %v513_v33, %v512_v57 }
  0x58   : > { %v918_v18 = vpop.eup %917 }
  0x59   : > { %v920_v25 = vpop.eup %919 }
  0x5a   : > { %v609_v27 = vcombine.low %v918_v18, %v920_v25 }
  0x5c   : > { %v616_v45 = vrot.slane %v609_v27, %v478_v19 }
  0x5e   : > { %v623_v53 = vrot.slane %v616_v45, %v478_v19 }
  0x60   : > { %v625_v62 = vsel %vm1066_vm5, %v623_v53, 0.0 }
  0x61   : > { %v630_v4 = vrot.slane %v625_v62, %v1027_v30  ;;  %v634_v5 = vrot.slane %v625_v62, %v1030_v32 }
  0x63   : > { %v637_v12 = vsel %vm547_vm6, %v630_v4, 0.0  ;;  %v638_v13 = vsel %vm547_vm6, %v634_v5, 0.0 }
  0x64   : > { %v639_v25 = vadd.f32 %v638_v13, %v637_v12 }
  0x87   : > { %v442_v20 = vpop.permute.xlu0 %441 }
  0x88   : > { %v444_v26 = vsel %vm1039_vm1, %v442_v20, 0.0  ;;  %v445_v22 = vsel %vm1044_vm2, %v442_v20, 0.0 }
  0x89   : > { %v446_v23 = vsel %vm370_vm0, %v444_v26, 0.0  ;;  %v453_v28 = vsel %vm370_vm0, %v445_v22, 0.0  ;;  %v653_v26 = vsel %vm547_vm6, %v507_v10, 0.0  ;;  %v654_v22 = vsel %vm547_vm6, %v514_v14, 0.0 }
  0x8a   : > { %v447_v34 = vrot.slane %v446_v23, 4  ;;  %v454_v35 = vrot.slane %v453_v28, 4 }
  0x8c   : > { %v448_v37 = vadd.f32 %v447_v34, %v446_v23  ;;  %v455_v38 = vadd.f32 %v454_v35, %v453_v28  ;;  %v655_v23 = vadd.f32 %v654_v22, %v653_v26 }
  0x8e   : > { %v449_v43 = vrot.slane %v448_v37, 2  ;;  %v456_v40 = vrot.slane %v455_v38, 2 }
  0x90   : > { %v450_v42 = vadd.f32 %v449_v43, %v448_v37  ;;  %v457_v46 = vadd.f32 %v456_v40, %v455_v38 }
  0x92   : > { %v451_v49 = vrot.slane %v450_v42, 1  ;;  %v458_v50 = vrot.slane %v457_v46, 1 }
  0x94   : > { %v452_v54 = vadd.f32 %v451_v49, %v450_v42  ;;  %v459_v55 = vadd.f32 %v458_v50, %v457_v46 }
  0x96   : > { %v515_v58 = vmul.f32 %v489_v51, %v452_v54  ;;  %v516_v59 = vmul.f32 %v490_v52, %v459_v55  ;;  %v565_v60 = vcombine.low %v452_v54, %v459_v55 }
  0x98   : > { %v572_v63 = vrot.slane %v565_v60, %v478_v19  ;;  %v519_v0 = vcombine.low %v515_v58, %v516_v59 }
  0x9a   : > { %v579_v2 = vrot.slane %v572_v63, %v478_v19  ;;  %v526_v3 = vrot.slane %v519_v0, %v478_v19 }
  0x9c   : > { %v581_v6 = vsel %vm1066_vm5, %v579_v2, 0.0  ;;  %v533_v7 = vrot.slane %v526_v3, %v478_v19 }
  0x9d   : > { %v586_v8 = vrot.slane %v581_v6, %v1027_v30  ;;  %v590_v9 = vrot.slane %v581_v6, %v1030_v32 }
  0x9e   : > { %v535_v11 = vsel %vm1066_vm5, %v533_v7, 0.0 }
  0x9f   : > { %v593_v15 = vsel %vm547_vm6, %v586_v8, 0.0  ;;  %v594_v16 = vsel %vm547_vm6, %v590_v9, 0.0  ;;  %v540_v17 = vrot.slane %v535_v11, %v1027_v30  ;;  %v544_v18 = vrot.slane %v535_v11, %v1030_v32 }
  0xa0   : > { %v595_v19 = vadd.f32 %v594_v16, %v593_v15 }
  0xa1   : > { %v548_v20 = vsel %vm547_vm6, %v540_v17, 0.0  ;;  %v549_v21 = vsel %vm547_vm6, %v544_v18, 0.0 }
  0xa2   : > { %596 = vadd.xlane.f32.xlu1 %v595_v19  ;;  %v550_v24 = vadd.f32 %v549_v21, %v548_v20 }
  0xa4   : > { %551 = vadd.xlane.f32.xlu0 %v550_v24 }
  0xa6   : > { %640 = vadd.xlane.f32.xlu1 %v639_v25 }
  0xaa   : > { %656 = vadd.xlane.f32.xlu1 %v655_v23 }
 0x12f   : > { %v597_v28 = vpop.xlane.xlu1 %596 }
 0x130   : > { %v598_v30 = vrot.slane %v597_v28, 4 }
 0x131   : > { %v552_v29 = vpop.xlane.xlu0 %551 }
 0x132   : > { %v599_v32 = vadd.f32 %v598_v30, %v597_v28  ;;  %v553_v31 = vrot.slane %v552_v29, 4 }
 0x133   : > { %v641_v34 = vpop.xlane.xlu1 %640 }
 0x134   : > { %v600_v35 = vrot.slane %v599_v32, 2  ;;  %v554_v36 = vadd.f32 %v553_v31, %v552_v29  ;;  %v642_v27 = vrot.slane %v641_v34, 4 }
 0x136   : > { %v555_v37 = vrot.slane %v554_v36, 2  ;;  %v643_v38 = vadd.f32 %v642_v27, %v641_v34  ;;  %v601_v39 = vadd.f32 %v600_v35, %v599_v32 }
 0x137   : > { %v657_v41 = vpop.xlane.xlu1 %656 }
 0x138   : > { %v644_v43 = vrot.slane %v643_v38, 2  ;;  %v658_v40 = vrot.slane %v657_v41, 4  ;;  %v556_v44 = vadd.f32 %v555_v37, %v554_v36  ;;  %v602_v45 = vrot.slane %v601_v39, 1 }
 0x13a   : > { %v659_v42 = vadd.f32 %v658_v40, %v657_v41  ;;  %v557_v46 = vrot.slane %v556_v44, 1  ;;  %v645_v47 = vadd.f32 %v644_v43, %v643_v38  ;;  %v603_v51 = vadd.f32 %v602_v45, %v601_v39 }
 0x13c   : > { %v660_v48 = vrot.slane %v659_v42, 2  ;;  %v558_v49 = vadd.f32 %v557_v46, %v556_v44  ;;  %v646_v50 = vrot.slane %v645_v47, 1 }
 0x13e   : > { %v661_v52 = vadd.f32 %v660_v48, %v659_v42  ;;  %869 = vpush %v558_v49  ;;  %v647_v53 = vadd.f32 %v646_v50, %v645_v47 }
 0x13f   : > { %871 = vpush %v603_v51 }
 0x140   : > { %873 = vpush %v647_v53  ;;  %v662_v54 = vrot.slane %v661_v52, 1 }
 0x142   : > { %v663_v55 = vadd.f32 %v662_v54, %v661_v52 }
 0x144   : > { %875 = vpush %v663_v55 }
 0x16f   : > { %s870_s14 = spop %869 }
 0x170   : > { %v560_v56 = vstv %s870_s14  ;;  %s872_s18 = spop %871 }
 0x171   : > { %562 = vst.msk [vmem:[%s347_s13] sm:$0x1] %vm561_vm7, %v560_v56  ;;  %v605_v57 = vstv %s872_s18  ;;  %s874_s26 = spop %873 }
 0x172   : > { %606 = vst.msk [vmem:[%s353_s17] sm:$0x1] %vm561_vm7, %v605_v57  ;;  %v649_v58 = vstv %s874_s26 }
 0x173   : > { %650 = vst.msk [vmem:[%s359_s25] sm:$0x1] %vm561_vm7, %v649_v58 }
 0x175   : > { %s876_s30 = spop %875 }
 0x176   : > { %v665_v59 = vstv %s876_s30 }
 0x177   : > { %666 = vst.msk [vmem:[%s365_s29] sm:$0x1] %vm561_vm7, %v665_v59 }
 0x178 PF: > { %s17_s23 = sadd.s32 1, %s943_s23   ;;  %s1128_s21 = smov %s939_s22 }
 0x179   : > { %p14_p5 = scmp.ge.s32.totalorder %s17_s23, 4   ;;  %s1129_s22 = smov %s1131_s24 }
 0x17b   :  { %16 = sbr.rel (!%p14_p5) target bundleno = 2 (0x2), region = 101 }

</bundles_post_ra>
